<compile_context>
chip_gen: v7x
topology: tpu7x:2x2x1
jax: 0.10.0
libtpu: 0.0.40
codegen_flags: <defaults>
</compile_context>

<pallas_src>
import jax
import jax.numpy as jnp
from jax.experimental import pallas as pl
from jax.experimental.pallas import tpu as pltpu


def _neck_kernel(x_ref, w1_ref, b1_ref, w2_ref, b2_ref, o_ref):
    # x_ref : (1, C_in, t_hw)    streaming spatial tile (lanes = spatial)
    # w1_ref: (C_hid, C_in)      conv1 weight with BN folded in
    # b1_ref: (C_hid, 1)         conv1 bias with BN folded in (f32)
    # w2_ref: (C_out, C_hid)     conv2 weight
    # b2_ref: (C_out, 1)         conv2 bias (f32)
    # o_ref : (1, C_out, t_hw)
    x = x_ref[0]                                            # (C_in, t_hw)

    # conv1 (+ folded BN) + ReLU: contract channels on the sublane side.
    h = jnp.dot(w1_ref[...], x, preferred_element_type=jnp.float32)
    h = jnp.maximum(h + b1_ref[...], 0.0)                   # (C_hid, t_hw) f32

    # conv2
    y = jnp.dot(w2_ref[...], h.astype(w2_ref.dtype),
                preferred_element_type=jnp.float32)
    o_ref[0] = (y + b2_ref[...]).astype(o_ref.dtype)


def _tile_bytes(t, itemsize, c_in, c_hid, c_out):
    """Conservative VMEM estimate for one spatial tile of width t."""
    return (2 * c_in * t * itemsize                     # double-buffered x
            + 2 * c_out * t * itemsize                  # double-buffered out
            + (c_hid + c_out) * t * 4                   # f32 intermediates h, y
            + 2 * (c_hid * c_in + c_out * c_hid) * itemsize  # weight buffers
            + 2 * (c_hid + c_out) * 4)                  # bias buffers


def _pick_tile(hw, dtype, c_in, c_hid, c_out, target, vmem_budget):
    """Return (tile, pad) for the spatial axis."""
    itemsize = jnp.dtype(dtype).itemsize

    def fits(t):
        return _tile_bytes(t, itemsize, c_in, c_hid, c_out) * 5 // 4 <= vmem_budget

    # 1) Whole-HW single block: no padding, and since block == full dim the
    #    128-divisibility constraint does not apply.
    if hw <= max(target, 2048) and fits(hw):
        return hw, 0

    cands = [t for t in (2048, 1024, 512, 256, 128) if t <= max(target, 128)]
    # 2) Prefer an exact divisor -> no HBM pad/slice copies.
    for t in cands:
        if hw % t == 0 and fits(t):
            return t, 0
    # 3) Fallback: largest fitting tile, pad the remainder.
    for t in cands:
        if fits(t):
            return t, (-hw) % t
    return 128, (-hw) % 128


def nonlinear_1x1_conv_neck(x_nchw, params, *, target_tile=2048,
                            vmem_budget=48 * 1024 * 1024):
    """Apply the neck to a single NCHW tensor. Returns an NCHW tensor."""
    w1, b1, bn_scale, bn_shift, w2, b2 = params
    N, C_in, H, W = x_nchw.shape
    C_hid = w1.shape[0]
    C_out = w2.shape[0]

    # Fold inference-mode BN into conv1 once, outside the kernel:
    #   bn(W1 x + b1) = (s*W1) x + (s*b1 + t)
    w1f = (w1 * bn_scale[:, None]).astype(x_nchw.dtype)
    b1f = (b1 * bn_scale + bn_shift).astype(jnp.float32).reshape(C_hid, 1)
    w2c = w2.astype(x_nchw.dtype)
    b2c = b2.astype(jnp.float32).reshape(C_out, 1)

    # NCHW -> (N, C, H*W): pure reshape in row-major layout, no transpose.
    HW = H * W
    x_rows = x_nchw.reshape(N, C_in, HW)

    t_hw, pad = _pick_tile(HW, x_nchw.dtype, C_in, C_hid, C_out,
                           target_tile, vmem_budget)
    if pad:
        # TODO(synk): a masked boundary tile would avoid this extra HBM copy.
        x_rows = jnp.pad(x_rows, ((0, 0), (0, 0), (0, pad)))
    HWp = HW + pad

    out = pl.pallas_call(
        _neck_kernel,
        out_shape=jax.ShapeDtypeStruct((N, C_out, HWp), x_nchw.dtype),
        grid_spec=pltpu.PrefetchScalarGridSpec(
            num_scalar_prefetch=0,
            grid=(N, HWp // t_hw),
            in_specs=[
                pl.BlockSpec((1, C_in, t_hw), lambda n, j: (n, 0, j)),   # x
                pl.BlockSpec((C_hid, C_in), lambda n, j: (0, 0)),        # W1'
                pl.BlockSpec((C_hid, 1), lambda n, j: (0, 0)),           # b1'
                pl.BlockSpec((C_out, C_hid), lambda n, j: (0, 0)),       # W2
                pl.BlockSpec((C_out, 1), lambda n, j: (0, 0)),           # b2
            ],
            out_specs=pl.BlockSpec((1, C_out, t_hw), lambda n, j: (n, 0, j)),
        ),
        compiler_params=pltpu.CompilerParams(
            dimension_semantics=("parallel", "parallel"),
            vmem_limit_bytes=vmem_budget),
    )(x_rows, w1f, b1f, w2c, b2c)

    if pad:
        out = out[:, :, :HW]
    # (N, C_out, H*W) -> NCHW: free reshape, no transpose.
    return out.reshape(N, C_out, H, W)


def make_params(key, in_channels, hid_channels, out_channels, eps=1e-5):
    """Deterministic synthetic parameters matching the module's shapes.

    Conv2d(in, hid, 1) weight (hid, in, 1, 1) is stored squeezed as (hid, in);
    likewise Conv2d(hid, out, 1) as (out, hid). BatchNorm2d(hid) running stats
    + affine are pre-combined into a per-channel scale/shift.
    """
    k1, k2, k3, k4, k5, k6 = jax.random.split(key, 6)
    w1 = 0.05 * jax.random.normal(k1, (hid_channels, in_channels), jnp.float32)
    b1 = 0.01 * jax.random.normal(k2, (hid_channels,), jnp.float32)
    w2 = 0.05 * jax.random.normal(k3, (out_channels, hid_channels), jnp.float32)
    b2 = 0.01 * jax.random.normal(k4, (out_channels,), jnp.float32)

    gamma = 1.0 + 0.1 * jax.random.normal(k5, (hid_channels,), jnp.float32)
    beta = 0.1 * jax.random.normal(k6, (hid_channels,), jnp.float32)
    running_mean = jnp.zeros((hid_channels,), jnp.float32)
    running_var = jnp.ones((hid_channels,), jnp.float32)

    inv_std = 1.0 / jnp.sqrt(running_var + eps)
    bn_scale = gamma * inv_std
    bn_shift = beta - running_mean * bn_scale
    return (w1, b1, bn_scale, bn_shift, w2, b2)


def _reference(x_nchw, params):
    """Pure-JAX reference of the same forward pass (unfolded BN)."""
    w1, b1, bn_scale, bn_shift, w2, b2 = params
    x = jnp.transpose(x_nchw, (0, 2, 3, 1))                  # NHWC
    h = jnp.einsum("nhwc,dc->nhwd", x, w1) + b1
    h = jnp.maximum(h * bn_scale + bn_shift, 0.0)
    y = jnp.einsum("nhwc,dc->nhwd", h, w2) + b2
    return jnp.transpose(y, (0, 3, 1, 2))                    # NCHW


if __name__ == "__main__":
    key = jax.random.PRNGKey(0)
    kx, kp = jax.random.split(key)

    N, C_in, H, W = 2, 4, 16, 16
    C_hid, C_out = 32, 8

    x = jax.random.normal(kx, (N, C_in, H, W), jnp.float32)
    params = make_params(kp, C_in, C_hid, C_out)

    fwd = jax.jit(lambda xs: nonlinear_1x1_conv_neck(xs, params))

    # Module forward takes/returns a length-1 list of tensors.
    inputs = [x]
    assert len(inputs) == 1
    out = fwd(inputs[0])
    outputs = [out]

    jax.block_until_ready(outputs[0])

    ref = _reference(x, params)
    assert outputs[0].shape == (N, C_out, H, W)
    assert jnp.allclose(outputs[0], ref, atol=1e-4, rtol=1e-4)

    print("KERNEL_OK")
</pallas_src>

<mosaic_0001>
module attributes {stable_mosaic.version = 11 : i64} {
  func.func @_neck_kernel(%arg0: i32, %arg1: i32, %arg2: memref<1x4x256xf32, #tpu.memory_space<vmem>>, %arg3: memref<32x4xf32, #tpu.memory_space<vmem>>, %arg4: memref<32x1xf32, #tpu.memory_space<vmem>>, %arg5: memref<8x32xf32, #tpu.memory_space<vmem>>, %arg6: memref<8x1xf32, #tpu.memory_space<vmem>>, %arg7: memref<1x8x256xf32, #tpu.memory_space<vmem>>) attributes {dimension_semantics = [#tpu.dimension_semantics<parallel>, #tpu.dimension_semantics<parallel>], iteration_bounds = array<i64: 2, 1>, scalar_prefetch = 0 : i64, scratch_operands = 0 : i64, tpu.core_type = #tpu.core_type<tc>, window_params = [{transform_indices = @transform_0, window_bounds = array<i64: 1, 4, 256>}, {pipeline_mode = #tpu.pipeline_mode<synchronous>, transform_indices = @transform_1, window_bounds = array<i64: 32, 4>}, {pipeline_mode = #tpu.pipeline_mode<synchronous>, transform_indices = @transform_2, window_bounds = array<i64: 32, 1>}, {pipeline_mode = #tpu.pipeline_mode<synchronous>, transform_indices = @transform_3, window_bounds = array<i64: 8, 32>}, {pipeline_mode = #tpu.pipeline_mode<synchronous>, transform_indices = @transform_4, window_bounds = array<i64: 8, 1>}, {transform_indices = @transform_5, window_bounds = array<i64: 1, 8, 256>}]} {
    %c0 = arith.constant 0 : index
    %c0_0 = arith.constant 0 : index
    %c0_1 = arith.constant 0 : index
    %0 = vector.load %arg2[%c0, %c0_0, %c0_1] : memref<1x4x256xf32, #tpu.memory_space<vmem>>, vector<1x4x256xf32>
    %1 = vector.shape_cast %0 : vector<1x4x256xf32> to vector<4x256xf32>
    %c0_2 = arith.constant 0 : index
    %c0_3 = arith.constant 0 : index
    %2 = vector.load %arg3[%c0_2, %c0_3] : memref<32x4xf32, #tpu.memory_space<vmem>>, vector<32x4xf32>
    %cst = arith.constant dense<0.000000e+00> : vector<32x256xf32>
    %3 = tpu.matmul %2, %1, %cst {dimension_numbers = #tpu.dot_dimension_numbers<[1], [0], [0], [1], [0, 0, 1, 1], [], []>} : vector<32x4xf32>, vector<4x256xf32>, vector<32x256xf32> -> vector<32x256xf32>
    %c0_4 = arith.constant 0 : index
    %c0_5 = arith.constant 0 : index
    %4 = vector.load %arg4[%c0_4, %c0_5] : memref<32x1xf32, #tpu.memory_space<vmem>>, vector<32x1xf32>
    %5 = vector.broadcast %4 : vector<32x1xf32> to vector<32x256xf32>
    %6 = arith.addf %3, %5 : vector<32x256xf32>
    %cst_6 = arith.constant 0.000000e+00 : f32
    %7 = vector.broadcast %cst_6 : f32 to vector<32x256xf32>
    %8 = arith.maximumf %6, %7 : vector<32x256xf32>
    %c0_7 = arith.constant 0 : index
    %c0_8 = arith.constant 0 : index
    %9 = vector.load %arg5[%c0_7, %c0_8] : memref<8x32xf32, #tpu.memory_space<vmem>>, vector<8x32xf32>
    %cst_9 = arith.constant dense<0.000000e+00> : vector<8x256xf32>
    %10 = tpu.matmul %9, %8, %cst_9 {dimension_numbers = #tpu.dot_dimension_numbers<[1], [0], [0], [1], [0, 0, 1, 1], [], []>} : vector<8x32xf32>, vector<32x256xf32>, vector<8x256xf32> -> vector<8x256xf32>
    %c0_10 = arith.constant 0 : index
    %c0_11 = arith.constant 0 : index
    %11 = vector.load %arg6[%c0_10, %c0_11] : memref<8x1xf32, #tpu.memory_space<vmem>>, vector<8x1xf32>
    %12 = vector.broadcast %11 : vector<8x1xf32> to vector<8x256xf32>
    %13 = arith.addf %10, %12 : vector<8x256xf32>
    %c0_12 = arith.constant 0 : index
    %c0_13 = arith.constant 0 : index
    %c0_14 = arith.constant 0 : index
    %14 = vector.load %arg7[%c0_12, %c0_13, %c0_14] : memref<1x8x256xf32, #tpu.memory_space<vmem>>, vector<1x8x256xf32>
    %15 = vector.shape_cast %14 : vector<1x8x256xf32> to vector<8x256xf32>
    %16 = vector.shape_cast %13 : vector<8x256xf32> to vector<1x8x256xf32>
    tpu.vector_store %arg7[%c0_12, %c0_13, %c0_14], %16 {strides = array<i32>} : memref<1x8x256xf32, #tpu.memory_space<vmem>>, vector<1x8x256xf32>,
    return
  }
  func.func @transform_0(%arg0: i32, %arg1: i32) -> (i32, i32, i32) {
    %c0_i32 = arith.constant 0 : i32
    %c0_i32_0 = arith.constant 0 : i32
    return %arg0, %c0_i32, %arg1 : i32, i32, i32
  }
  func.func @transform_1(%arg0: i32, %arg1: i32) -> (i32, i32) {
    %c0_i32 = arith.constant 0 : i32
    %c0_i32_0 = arith.constant 0 : i32
    %c0_i32_1 = arith.constant 0 : i32
    return %c0_i32, %c0_i32_0 : i32, i32
  }
  func.func @transform_2(%arg0: i32, %arg1: i32) -> (i32, i32) {
    %c0_i32 = arith.constant 0 : i32
    %c0_i32_0 = arith.constant 0 : i32
    %c0_i32_1 = arith.constant 0 : i32
    return %c0_i32, %c0_i32_0 : i32, i32
  }
  func.func @transform_3(%arg0: i32, %arg1: i32) -> (i32, i32) {
    %c0_i32 = arith.constant 0 : i32
    %c0_i32_0 = arith.constant 0 : i32
    %c0_i32_1 = arith.constant 0 : i32
    return %c0_i32, %c0_i32_0 : i32, i32
  }
  func.func @transform_4(%arg0: i32, %arg1: i32) -> (i32, i32) {
    %c0_i32 = arith.constant 0 : i32
    %c0_i32_0 = arith.constant 0 : i32
    %c0_i32_1 = arith.constant 0 : i32
    return %c0_i32, %c0_i32_0 : i32, i32
  }
  func.func @transform_5(%arg0: i32, %arg1: i32) -> (i32, i32, i32) {
    %c0_i32 = arith.constant 0 : i32
    %c0_i32_0 = arith.constant 0 : i32
    return %arg0, %c0_i32, %arg1 : i32, i32, i32
  }
}

</mosaic_0001>

<bundles_post_ra>
// kernel: _lambda_.1
= control target key start
LH: loop header
LB: loop body
LE: loop exit
PB: predicated region body
PF: predicated region fallthrough
CT: control target
= control target key end

     0   :  { %s694_s18 = smov 0   ;;  %s696_s19 = smov 0   ;;  %s761_s0 = inlined_call_operand.vmem [shape: f32[2,4,256], index: 0, kind: input, shape index: {}]   ;;  %s762_s1 = inlined_call_operand.vmem [shape: f32[32,4], index: 1, kind: input, shape index: {}]   ;;  %s763_s2 = inlined_call_operand.vmem [shape: f32[32,1], index: 2, kind: input, shape index: {}]   ;;  %s764_s3 = inlined_call_operand.vmem [shape: f32[8,32], index: 3, kind: input, shape index: {}]   ;;  %s765_s4 = inlined_call_operand.vmem [shape: f32[8,1], index: 4, kind: input, shape index: {}]   ;;  %s766_s5 = inlined_call_operand.vmem [shape: f32[2,8,256], index: 5, kind: output, shape index: {}]  }
   0x1   :  { %s698_s20 = smov 0  }
   0x2 LB: > { %s27_s21 = sadd.s32 1, %s656_s19  ;;  %p585_p0 = scmp.ge.s32.totalorder %s660_s20, 1  ;;  %s660_s20 = sphi %s698_s20, %s15_s20   ;;  %s656_s19 = sphi %s696_s19, %s768_s19   ;;  %s652_s18 = sphi %s694_s18, %s767_s18  }
   0x3   : > { %p29_p1 = scmp.ge.s32.totalorder %s27_s21, 2  ;;  %p208_p2 = scmp.lt.s32.totalorder %s660_s20, 3 }
   0x5   : > { %s770_s21 = smov (%p29_p1, %s27_s21), 0  ;;  %p209_p3 = pnand %p585_p0, %p208_p2 }
   0x6   : > { %p245_p4 = scmp.lt.s32.totalorder (!%p209_p3), %s652_s18, 1  ;;  %v662_v0 = vmov (!%p209_p3), 0.0   ;;  %v269_v1 = vld [vmem:[%s763_s2] sm:$0xff] (!%p209_p3)  ;;  %v663_v2 = vmov (!%p209_p3), 0   ;;  %v271_v3 = vld [vmem:[%s763_s2 + $0x10] sm:$0xff] (!%p209_p3)  ;;  %v270_v4 = vld [vmem:[%s763_s2 + $0x8] sm:$0xff] (!%p209_p3) }
   0x7   : > { %212 = sbr.rel (%p209_p3) target bundleno = 473 (0x1d9), region = 40  ;;  %377 = vmatprep.mubr.f32.mxu0 (!%p209_p3), %v662_v0  ;;  %485 = vmatprep.mubr.f32.mxu1 (!%p209_p3), %v662_v0  ;;  %v272_v5 = vld [vmem:[%s763_s2 + $0x18] sm:$0xff] (!%p209_p3)  ;;  %vm308_vm0 = vcmask (!%p209_p3), 1043456   ;;  %v265_v8 = vld [vmem:[%s762_s1] sm:$0xff] (!%p209_p3)  ;;  %vm295_vm1 = vcmask (!%p209_p3), 31744   ;;  %v266_v10 = vld [vmem:[%s762_s1 + $0x8] sm:$0xff] (!%p209_p3) }
   0x8   : > { %635 = vset.pattern.permute.xlu0 (!%p209_p3), %v663_v2  ;;  %636 = vset.pattern.permute.xlu1 (!%p209_p3), %v663_v2  ;;  %v411_v9 = vld [vmem:[%s765_s4] sm:$0xff] (!%p209_p3)  ;;  %v267_v11 = vld [vmem:[%s762_s1 + $0x10] sm:$0xff] (!%p209_p3)  ;;  %v268_v12 = vld [vmem:[%s762_s1 + $0x18] sm:$0xff] (!%p209_p3)  ;;  %vm417_vm2 = vcmask (!%p209_p3), 261120  }
   0x9   : > { %275 = vperm.xlu0 (!%p209_p3), %635, %v269_v1   ;;  %285 = vperm.xlu1 (!%p209_p3), %636, %v271_v3   ;;  %v410_v45 = vld [vmem:[%s764_s3] sm:$0xff] (!%p209_p3) }
   0xd   : > { %280 = vperm.xlu0 (!%p209_p3), %635, %v270_v4   ;;  %290 = vperm.xlu1 (!%p209_p3), %636, %v272_v5  }
   0xe   : > { %s772_s18 = smov (!%p245_p4, %s652_s18), 1 }
   0xf   : > { %s599_s26 = sshll.u32 %s772_s18, 3  ;;  %s600_s25 = sshll.u32 %s772_s18, 4 }
  0x10   : > { %s252_s8 = scalar_lea.vmem %s761_s0, %s599_s26  ;;  %s262_s28 = scalar_lea.vmem %s766_s5, %s600_s25 }
  0x11   : > { %v264_v6 = vld [vmem:[%s252_s8] sm:$0xff]  ;;  %414 = vperm.xlu0 %635, %v411_v9  }
  0x12   : > { %v294_v7 = vcombine.high %v264_v6, %v264_v6 }
  0x14   : > { %590 = vmatprep.subr.msk.mxu0 %vm308_vm0, %v294_v7 }
  0x15   : > { %591 = vmatpush1.msk.msra.mxu0 %vm308_vm0, %v264_v6 }
  0x16   : > { %592 = vmatmul.mubr.msk.f32.vlgmr.msra.gmra.mrb[0].mxu0 %vm295_vm1, %v265_v8 }
  0x17   : > { %383 = vmatprep.mubr.f32.mxu0 %v662_v0 }
  0x1a   : > { %593 = vmatmul.mubr.msk.f32.gmra.mrb[2].mxu0 %vm295_vm1, %v266_v10 }
  0x1b   : > { %389 = vmatprep.mubr.f32.mxu0 %v662_v0 }
  0x1e   : > { %594 = vmatmul.mubr.msk.f32.gmra.mrb[4].mxu0 %vm295_vm1, %v267_v11 }
  0x1f   : > { %395 = vmatprep.mubr.f32.mxu0 %v662_v0 }
  0x22   : > { %595 = vmatmul.mubr.msk.f32.gmra.mrb[6].mxu0 %vm295_vm1, %v268_v12 }
  0x88   : > { %v276_v13 = vpop.permute.xlu0 %275  ;;  %v286_v22 = vpop.permute.xlu1 %285 }
  0x8c   : > { %v281_v17 = vpop.permute.xlu0 %280  ;;  %v291_v33 = vpop.permute.xlu1 %290 }
  0x90   : > { %v415_v46 = vpop.permute.xlu0 %414 }
  0xe9   : > { %v379_v14 = vpop.f32.mrb[0].mxu0 }
  0xea   : > { %v381_v15 = vpop.f32.mrb[1].mxu0  ;;  %v380_v16 = vadd.f32 %v379_v14, %v276_v13 }
  0xeb   : > { %v382_v18 = vadd.f32 %v381_v15, %v276_v13 }
  0xec   : > { %v402_v24 = vmax.f32 %v380_v16, 0.0 }
  0xed   : > { %v385_v19 = vpop.f32.mrb[2].mxu0  ;;  %v403_v26 = vmax.f32 %v382_v18, 0.0 }
  0xee   : > { %v386_v20 = vadd.f32 %v385_v19, %v281_v17  ;;  %v387_v21 = vpop.f32.mrb[3].mxu0 }
  0xef   : > { %v388_v23 = vadd.f32 %v387_v21, %v281_v17 }
  0xf0   : > { %v404_v25 = vmax.f32 %v386_v20, 0.0 }
  0xf1   : > { %v405_v27 = vmax.f32 %v388_v23, 0.0  ;;  %v391_v28 = vpop.f32.mrb[4].mxu0 }
  0xf2   : > { %v393_v29 = vpop.f32.mrb[5].mxu0  ;;  %v603_v30 = vpack.c.bf16 %v404_v25, %v402_v24  ;;  %v392_v32 = vadd.f32 %v391_v28, %v286_v22 }
  0xf3   : > { %v601_v31 = vpack.c.bf16 %v405_v27, %v403_v26  ;;  %v394_v34 = vadd.f32 %v393_v29, %v286_v22 }
  0xf4   : > { %v406_v39 = vmax.f32 %v392_v32, 0.0 }
  0xf5   : > { %v397_v35 = vpop.f32.mrb[6].mxu0  ;;  %602 = vmatprep.subr.bf16.mxu1 %v601_v31  ;;  %v407_v41 = vmax.f32 %v394_v34, 0.0 }
  0xf6   : > { %v398_v36 = vadd.f32 %v397_v35, %v291_v33  ;;  %v399_v37 = vpop.f32.mrb[7].mxu0  ;;  %604 = vmatpush1.bf16.msra.mxu1 %v603_v30 }
  0xf7   : > { %v400_v38 = vadd.f32 %v399_v37, %v291_v33 }
  0xf8   : > { %v408_v40 = vmax.f32 %v398_v36, 0.0 }
  0xf9   : > { %v409_v42 = vmax.f32 %v400_v38, 0.0 }
  0xfa   : > { %v607_v43 = vpack.c.bf16 %v408_v40, %v406_v39 }
  0xfb   : > { %v605_v44 = vpack.c.bf16 %v409_v42, %v407_v41 }
  0xfd   : > { %606 = vmatprep.subr.bf16.mxu1 %v605_v44 }
  0xfe   : > { %608 = vmatpush1.bf16.msra.mxu1 %v607_v43 }
 0x101   : > { %596 = vmatmul.mubr.msk.f32.vlgmr.msra.gmra.mrb[0].mxu1 %vm417_vm2, %v410_v45 }
 0x1d4   : > { %v487_v47 = vpop.f32.mrb[0].mxu1 }
 0x1d5   : > { %v488_v48 = vadd.f32 %v487_v47, %v415_v46  ;;  %v489_v49 = vpop.f32.mrb[1].mxu1 }
 0x1d6   : > { %v490_v50 = vadd.f32 %v489_v49, %v415_v46 }
 0x1d7   : > { %492 = vst [vmem:[%s262_s28] sm:$0xff] %v488_v48 }
 0x1d8   : > { %493 = vst [vmem:[%s262_s28 + $0x8] sm:$0xff] %v490_v50 }
 0x1d9 PF: > { %s15_s20 = sadd.s32 1, %s660_s20   ;;  %s767_s18 = smov %s656_s19 }
 0x1da   : > { %p12_p5 = scmp.ge.s32.totalorder %s15_s20, 4   ;;  %s768_s19 = smov %s770_s21 }
 0x1dc   :  { %14 = sbr.rel (!%p12_p5) target bundleno = 2 (0x2), region = 70 }

</bundles_post_ra>
